<compile_context>
chip_gen: v5e
topology: v5e:2x2
jax: 0.10.0
libtpu: 0.0.40
codegen_flags: <defaults>
</compile_context>

<pallas_src>
import math

import jax
import jax.numpy as jnp
from jax.experimental import pallas as pl
from jax.experimental.pallas import tpu as pltpu


def _round_up(x: int, m: int) -> int:
    return ((x + m - 1) // m) * m


def _sublane_pack(dtype) -> int:
    # Rows per packed sublane tile: f32 -> 8, bf16 -> 16, int8/fp8 -> 32.
    return 8 * max(1, 4 // jnp.dtype(dtype).itemsize)


_VMEM_BUDGET = 48 * 1024 * 1024      # conservative vs. v7x 64 MiB physical VMEM
_SINGLE_BUFFER_WEIGHTS_OK = True     # flipped off if pl.Buffered(1) is unavailable


# ----------------------------------------------------------------------------
# Pallas kernel: fused  y = relu(x @ W1 + b1) @ W2 + b2   (per (TM, TN) tile)
# ----------------------------------------------------------------------------
def _fused_mlp_kernel(x_ref, w1_ref, b1_ref, w2_ref, b2_ref, o_ref):
    # x_ref: (TM, Kp)   w1_ref: (Kp, Hp)   b1_ref: (1, Hp)   [b* are f32]
    # w2_ref: (Hp, TN)  b2_ref: (1, TN)    o_ref: (TM, TN)
    x = x_ref[...].astype(w1_ref.dtype)            # cast in VMEM (no HBM copy)
    h = jnp.dot(x, w1_ref[...], preferred_element_type=jnp.float32)
    h = jnp.maximum(h + b1_ref[...], 0.0)          # f32 epilogue (v5e-safe)
    h = h.astype(w2_ref.dtype)
    y = jnp.dot(h, w2_ref[...], preferred_element_type=jnp.float32)
    o_ref[...] = (y + b2_ref[...]).astype(o_ref.dtype)


def fused_mlp_pallas(x2d, w1p, b1p, w2p, b2p, *, out_dtype, tm: int = 512):
    """y = relu(x2d @ W1 + b1) @ W2 + b2 with PRE-PADDED weights in one call.

    x2d: (M, K).  w1p: (Kp, Hp), b1p: (1, Hp) f32, w2p: (Hp, Np), b2p: (1, Np) f32.
    Returns (M, Np) in `out_dtype` (caller slices off lane padding).
    """
    global _SINGLE_BUFFER_WEIGHTS_OK

    M, K = x2d.shape
    Kp, Hp = w1p.shape
    Hp2, Np = w2p.shape
    assert Hp == Hp2

    cd = w1p.dtype
    pack = _sublane_pack(cd)
    x_isz = jnp.dtype(x2d.dtype).itemsize
    cd_isz = jnp.dtype(cd).itemsize
    out_isz = jnp.dtype(out_dtype).itemsize

    # Only K may need padding on the activation side (lane dim of x / sublane
    # dim of W1); it is a cheap last-dim pad and only happens when misaligned.
    if K != Kp:
        x2d = jnp.pad(x2d, ((0, 0), (0, Kp - K)))

    # ---- VMEM-aware tile selection (v7x 64 MiB safe) ----
    TM = max(pack, min(_round_up(tm, pack), _round_up(M, pack)))
    TN = Np

    def vmem_est(tm_, tn_, wbuf):
        w2buf = wbuf if tn_ == Np else 2
        return (2 * tm_ * Kp * x_isz                      # streamed x tile (2-buf)
                + 2 * tm_ * tn_ * out_isz                 # streamed out tile (2-buf)
                + wbuf * (Kp * Hp * cd_isz + Hp * 4)      # resident W1, b1
                + w2buf * (Hp * tn_ * cd_isz + tn_ * 4))  # W2, b2

    while vmem_est(TM, TN, 1) > _VMEM_BUDGET and TN > 256:   # tile N for huge H
        TN = max(256, _round_up(TN // 2, 128))
    while vmem_est(TM, TN, 1) > _VMEM_BUDGET and TM > pack:
        TM = max(pack, _round_up(TM // 2, pack))
    # v7x megacore: ensure >=2 parallel grid steps when possible (2 TensorCores).
    while pl.cdiv(M, TM) * pl.cdiv(Np, TN) < 2 and TM >= 2 * pack:
        TM = _round_up(TM // 2, pack)

    m_tiles = pl.cdiv(M, TM)
    n_tiles = pl.cdiv(Np, TN)

    flops = 2 * M * Kp * Hp * n_tiles + 2 * M * Hp * Np
    bytes_accessed = (M * Kp * x_isz + Kp * Hp * cd_isz + Hp * 4
                      + Hp * Np * cd_isz + Np * 4 + M * Np * out_isz)
    vmem_limit = int(min(64 * 1024 * 1024,
                         max(8 * 1024 * 1024, vmem_est(TM, TN, 2) * 5 // 4)))

    def run(single_buffer_weights: bool):
        def resident(shape, imap):
            # Constant-index operands: single-buffer to halve their VMEM cost.
            if single_buffer_weights:
                return pl.BlockSpec(shape, imap, pipeline_mode=pl.Buffered(1))
            return pl.BlockSpec(shape, imap)

        if n_tiles == 1:
            w2_spec = resident((Hp, TN), lambda i, j: (0, j))
            b2_spec = resident((1, TN), lambda i, j: (0, j))
        else:  # N-tiled: keep default double-buffering for pipelining
            w2_spec = pl.BlockSpec((Hp, TN), lambda i, j: (0, j))
            b2_spec = pl.BlockSpec((1, TN), lambda i, j: (0, j))

        return pl.pallas_call(
            _fused_mlp_kernel,
            out_shape=jax.ShapeDtypeStruct((M, Np), out_dtype),
            grid=(m_tiles, n_tiles),
            in_specs=[
                pl.BlockSpec((TM, Kp), lambda i, j: (i, 0)),   # x streams over M
                resident((Kp, Hp), lambda i, j: (0, 0)),       # W1 resident
                resident((1, Hp), lambda i, j: (0, 0)),        # b1 resident
                w2_spec,                                       # W2
                b2_spec,                                       # b2
            ],
            out_specs=pl.BlockSpec((TM, TN), lambda i, j: (i, j)),
            compiler_params=pltpu.CompilerParams(
                dimension_semantics=("parallel", "parallel"),
                vmem_limit_bytes=vmem_limit),
            cost_estimate=pl.CostEstimate(flops=flops, transcendentals=0,
                                          bytes_accessed=bytes_accessed),
        )(x2d, w1p, b1p, w2p, b2p)

    if _SINGLE_BUFFER_WEIGHTS_OK:
        try:
            return run(True)
        except Exception:     # pl.Buffered(1) not supported on this jax build
            _SINGLE_BUFFER_WEIGHTS_OK = False
    return run(False)


# ----------------------------------------------------------------------------
# Encoder step + SequentialEncoder container (faithful to the torch forward)
# ----------------------------------------------------------------------------
class FusedMLPEncoderStep:
    """One EncoderStep fusing two linears + ReLU: reads state[in_keys[0]],
    writes state[out_keys[0]].  Weights are padded/cast ONCE here; forward is
    a single pallas_call."""

    def __init__(self, w1, b1, w2, b2, in_keys=("main",), out_keys=("output",),
                 compute_dtype=jnp.bfloat16, out_dtype=None,
                 lane_multiple=128, tm=512):
        K, H = w1.shape
        H2, N = w2.shape
        assert H == H2 and b1.shape == (H,) and b2.shape == (N,)
        self.in_keys = tuple(in_keys)
        self.out_keys = tuple(out_keys)
        self.N = N
        self.tm = tm
        cd = jnp.dtype(compute_dtype)
        self.out_dtype = jnp.dtype(out_dtype) if out_dtype is not None else cd

        pack = _sublane_pack(cd)
        # TODO(synk): on v6e/v7x a lane_multiple of 256 matches the 2x256^2 MXU
        # tile; 128 is already optimal on v5e and correct on every generation.
        Kp = _round_up(K, pack)
        Hp = _round_up(H, lane_multiple)
        Np = _round_up(N, lane_multiple)
        # One-time zero-padding + cast (mathematically exact).
        self.w1p = jnp.zeros((Kp, Hp), cd).at[:K, :H].set(w1.astype(cd))
        self.b1p = jnp.zeros((1, Hp), jnp.float32).at[0, :H].set(
            b1.astype(jnp.float32))
        self.w2p = jnp.zeros((Hp, Np), cd).at[:H, :N].set(w2.astype(cd))
        self.b2p = jnp.zeros((1, Np), jnp.float32).at[0, :N].set(
            b2.astype(jnp.float32))

    def __call__(self, state, single_eval_pos: int = 0, **kwargs):
        x = state[self.in_keys[0]]                       # (S, B, F_in), seq-first
        S, B, F = x.shape
        y2d = fused_mlp_pallas(x.reshape(S * B, F), self.w1p, self.b1p,
                               self.w2p, self.b2p,
                               out_dtype=self.out_dtype, tm=self.tm)
        y = y2d[:, :self.N].reshape(S, B, self.N)        # drop lane padding
        new_state = dict(state)
        new_state[self.out_keys[0]] = y
        return new_state


class SequentialEncoder:
    """Mirrors torch SequentialEncoder.forward exactly:
       - wrap non-dict input using the first step's single in_key
       - thread the dict through every step (kwargs passed along)
       - return state[output_key] (or whole dict if output_key is None)."""

    def __init__(self, *steps, output_key="output"):
        self.steps = list(steps)
        self.output_key = output_key

    def __call__(self, input, **kwargs):
        if not isinstance(input, dict):
            if len(self.steps[0].in_keys) == 1:
                input = {self.steps[0].in_keys[0]: input}
        for module in self.steps:
            input = module(input, **kwargs)
        return input[self.output_key] if self.output_key is not None else input


# ----------------------------------------------------------------------------
# Demo / correctness check
# ----------------------------------------------------------------------------
if __name__ == "__main__":
    # TODO(synk): SequentialEncoder in the reference is an abstract container;
    # the concrete EncoderStep compute (two linears + ReLU) is supplied here
    # and fused into one Pallas kernel.
    key = jax.random.PRNGKey(0)
    kx, k1, k2, k3, k4 = jax.random.split(key, 5)

    seq, batch, num_features, hidden = 8, 2, 4, 32
    x = jax.random.normal(kx, (seq, batch, num_features), jnp.float32)

    # nn.Linear-style uniform(-1/sqrt(fan_in), 1/sqrt(fan_in)) init.
    lim1 = 1.0 / math.sqrt(num_features)
    lim2 = 1.0 / math.sqrt(hidden)
    w1 = jax.random.uniform(k1, (num_features, hidden), jnp.float32, -lim1, lim1)
    b1 = jax.random.uniform(k2, (hidden,), jnp.float32, -lim1, lim1)
    w2 = jax.random.uniform(k3, (hidden, hidden), jnp.float32, -lim2, lim2)
    b2 = jax.random.uniform(k4, (hidden,), jnp.float32, -lim2, lim2)

    # Plain-JAX reference (same math, f32).
    ref = x.reshape(seq * batch, num_features)
    ref = jnp.maximum(ref @ w1 + b1, 0.0) @ w2 + b2
    ref = ref.reshape(seq, batch, hidden)

    # Exact-precision path (f32 compute / f32 output): tight tolerance.
    enc_f32 = SequentialEncoder(
        FusedMLPEncoderStep(w1, b1, w2, b2, in_keys=("main",),
                            out_keys=("output",),
                            compute_dtype=jnp.float32, out_dtype=jnp.float32),
        output_key="output")
    out_f32 = jax.block_until_ready(enc_f32(x, single_eval_pos=4))
    assert out_f32.shape == (seq, batch, hidden)
    assert jnp.allclose(out_f32, ref, atol=1e-5, rtol=1e-5)

    # Default path (bf16 compute + bf16 output = full MXU rate, half the HBM
    # traffic on v5e/v6e/v7x): relaxed tolerance for expected precision loss.
    enc_bf16 = SequentialEncoder(
        FusedMLPEncoderStep(w1, b1, w2, b2, in_keys=("main",),
                            out_keys=("output",)),
        output_key="output")
    out_bf16 = jax.block_until_ready(enc_bf16(x, single_eval_pos=4))
    assert out_bf16.shape == (seq, batch, hidden)
    assert out_bf16.dtype == jnp.bfloat16
    assert jnp.allclose(out_bf16.astype(jnp.float32), ref, atol=1e-1, rtol=5e-2)

    print("KERNEL_OK")
</pallas_src>

<mosaic_0001>
module attributes {stable_mosaic.version = 11 : i64} {
  func.func @_fused_mlp_kernel(%arg0: i32, %arg1: i32, %arg2: memref<8x8xf32, #tpu.memory_space<vmem>>, %arg3: memref<8x128xf32, #tpu.memory_space<vmem>>, %arg4: memref<1x128xf32, #tpu.memory_space<vmem>>, %arg5: memref<128x128xf32, #tpu.memory_space<vmem>>, %arg6: memref<1x128xf32, #tpu.memory_space<vmem>>, %arg7: memref<8x128xf32, #tpu.memory_space<vmem>>) attributes {dimension_semantics = [#tpu.dimension_semantics<parallel>, #tpu.dimension_semantics<parallel>], iteration_bounds = array<i64: 2, 1>, scalar_prefetch = 0 : i64, scratch_operands = 0 : i64, tpu.core_type = #tpu.core_type<tc>, window_params = [{transform_indices = @transform_0, window_bounds = array<i64: 8, 8>}, {pipeline_mode = #tpu.pipeline_mode<synchronous>, transform_indices = @transform_1, window_bounds = array<i64: 8, 128>}, {pipeline_mode = #tpu.pipeline_mode<synchronous>, transform_indices = @transform_2, window_bounds = array<i64: 1, 128>}, {pipeline_mode = #tpu.pipeline_mode<synchronous>, transform_indices = @transform_3, window_bounds = array<i64: 128, 128>}, {pipeline_mode = #tpu.pipeline_mode<synchronous>, transform_indices = @transform_4, window_bounds = array<i64: 1, 128>}, {transform_indices = @transform_5, window_bounds = array<i64: 8, 128>}]} {
    %c0 = arith.constant 0 : index
    %c0_0 = arith.constant 0 : index
    %0 = vector.load %arg2[%c0, %c0_0] : memref<8x8xf32, #tpu.memory_space<vmem>>, vector<8x8xf32>
    %c0_1 = arith.constant 0 : index
    %c0_2 = arith.constant 0 : index
    %1 = vector.load %arg3[%c0_1, %c0_2] : memref<8x128xf32, #tpu.memory_space<vmem>>, vector<8x128xf32>
    %cst = arith.constant dense<0.000000e+00> : vector<8x128xf32>
    %2 = tpu.matmul %0, %1, %cst {dimension_numbers = #tpu.dot_dimension_numbers<[1], [0], [0], [1], [0, 0, 1, 1], [], []>} : vector<8x8xf32>, vector<8x128xf32>, vector<8x128xf32> -> vector<8x128xf32>
    %c0_3 = arith.constant 0 : index
    %c0_4 = arith.constant 0 : index
    %3 = vector.load %arg4[%c0_3, %c0_4] : memref<1x128xf32, #tpu.memory_space<vmem>>, vector<1x128xf32>
    %4 = vector.broadcast %3 : vector<1x128xf32> to vector<8x128xf32>
    %5 = arith.addf %2, %4 : vector<8x128xf32>
    %cst_5 = arith.constant 0.000000e+00 : f32
    %6 = vector.broadcast %cst_5 : f32 to vector<8x128xf32>
    %7 = arith.maximumf %5, %6 : vector<8x128xf32>
    %c0_6 = arith.constant 0 : index
    %c0_7 = arith.constant 0 : index
    %8 = vector.load %arg5[%c0_6, %c0_7] : memref<128x128xf32, #tpu.memory_space<vmem>>, vector<128x128xf32>
    %cst_8 = arith.constant dense<0.000000e+00> : vector<8x128xf32>
    %9 = tpu.matmul %7, %8, %cst_8 {dimension_numbers = #tpu.dot_dimension_numbers<[1], [0], [0], [1], [0, 0, 1, 1], [], []>} : vector<8x128xf32>, vector<128x128xf32>, vector<8x128xf32> -> vector<8x128xf32>
    %c0_9 = arith.constant 0 : index
    %c0_10 = arith.constant 0 : index
    %10 = vector.load %arg6[%c0_9, %c0_10] : memref<1x128xf32, #tpu.memory_space<vmem>>, vector<1x128xf32>
    %11 = vector.broadcast %10 : vector<1x128xf32> to vector<8x128xf32>
    %12 = arith.addf %9, %11 : vector<8x128xf32>
    %c0_11 = arith.constant 0 : index
    %c0_12 = arith.constant 0 : index
    %13 = vector.load %arg7[%c0_11, %c0_12] : memref<8x128xf32, #tpu.memory_space<vmem>>, vector<8x128xf32>
    tpu.vector_store %arg7[%c0_11, %c0_12], %12 {strides = array<i32>} : memref<8x128xf32, #tpu.memory_space<vmem>>, vector<8x128xf32>,
    return
  }
  func.func @transform_0(%arg0: i32, %arg1: i32) -> (i32, i32) {
    %c0_i32 = arith.constant 0 : i32
    %c0_i32_0 = arith.constant 0 : i32
    return %arg0, %c0_i32 : i32, i32
  }
  func.func @transform_1(%arg0: i32, %arg1: i32) -> (i32, i32) {
    %c0_i32 = arith.constant 0 : i32
    %c0_i32_0 = arith.constant 0 : i32
    %c0_i32_1 = arith.constant 0 : i32
    return %c0_i32, %c0_i32_0 : i32, i32
  }
  func.func @transform_2(%arg0: i32, %arg1: i32) -> (i32, i32) {
    %c0_i32 = arith.constant 0 : i32
    %c0_i32_0 = arith.constant 0 : i32
    %c0_i32_1 = arith.constant 0 : i32
    return %c0_i32, %c0_i32_0 : i32, i32
  }
  func.func @transform_3(%arg0: i32, %arg1: i32) -> (i32, i32) {
    %c0_i32 = arith.constant 0 : i32
    %c0_i32_0 = arith.constant 0 : i32
    return %c0_i32, %arg1 : i32, i32
  }
  func.func @transform_4(%arg0: i32, %arg1: i32) -> (i32, i32) {
    %c0_i32 = arith.constant 0 : i32
    %c0_i32_0 = arith.constant 0 : i32
    return %c0_i32, %arg1 : i32, i32
  }
  func.func @transform_5(%arg0: i32, %arg1: i32) -> (i32, i32) {
    %c0_i32 = arith.constant 0 : i32
    return %arg0, %arg1 : i32, i32
  }
}

module attributes {stable_mosaic.version = 11 : i64} {
  func.func @_fused_mlp_kernel(%arg0: i32, %arg1: i32, %arg2: memref<8x8xf32, #tpu.memory_space<vmem>>, %arg3: memref<8x128xf32, #tpu.memory_space<vmem>>, %arg4: memref<1x128xf32, #tpu.memory_space<vmem>>, %arg5: memref<128x128xf32, #tpu.memory_space<vmem>>, %arg6: memref<1x128xf32, #tpu.memory_space<vmem>>, %arg7: memref<8x128xf32, #tpu.memory_space<vmem>>) attributes {dimension_semantics = [#tpu.dimension_semantics<parallel>, #tpu.dimension_semantics<parallel>], iteration_bounds = array<i64: 2, 1>, scalar_prefetch = 0 : i64, scratch_operands = 0 : i64, tpu.core_type = #tpu.core_type<tc>, window_params = [{transform_indices = @transform_0, window_bounds = array<i64: 8, 8>}, {pipeline_mode = #tpu.pipeline_mode<synchronous>, transform_indices = @transform_1, window_bounds = array<i64: 8, 128>}, {pipeline_mode = #tpu.pipeline_mode<synchronous>, transform_indices = @transform_2, window_bounds = array<i64: 1, 128>}, {transform_indices = @transform_3, window_bounds = array<i64: 128, 128>}, {transform_indices = @transform_4, window_bounds = array<i64: 1, 128>}, {transform_indices = @transform_5, window_bounds = array<i64: 8, 128>}]} {
    %c0 = arith.constant 0 : index
    %c0_0 = arith.constant 0 : index
    %0 = vector.load %arg2[%c0, %c0_0] : memref<8x8xf32, #tpu.memory_space<vmem>>, vector<8x8xf32>
    %c0_1 = arith.constant 0 : index
    %c0_2 = arith.constant 0 : index
    %1 = vector.load %arg3[%c0_1, %c0_2] : memref<8x128xf32, #tpu.memory_space<vmem>>, vector<8x128xf32>
    %cst = arith.constant dense<0.000000e+00> : vector<8x128xf32>
    %2 = tpu.matmul %0, %1, %cst {dimension_numbers = #tpu.dot_dimension_numbers<[1], [0], [0], [1], [0, 0, 1, 1], [], []>} : vector<8x8xf32>, vector<8x128xf32>, vector<8x128xf32> -> vector<8x128xf32>
    %c0_3 = arith.constant 0 : index
    %c0_4 = arith.constant 0 : index
    %3 = vector.load %arg4[%c0_3, %c0_4] : memref<1x128xf32, #tpu.memory_space<vmem>>, vector<1x128xf32>
    %4 = vector.broadcast %3 : vector<1x128xf32> to vector<8x128xf32>
    %5 = arith.addf %2, %4 : vector<8x128xf32>
    %cst_5 = arith.constant 0.000000e+00 : f32
    %6 = vector.broadcast %cst_5 : f32 to vector<8x128xf32>
    %7 = arith.maximumf %5, %6 : vector<8x128xf32>
    %c0_6 = arith.constant 0 : index
    %c0_7 = arith.constant 0 : index
    %8 = vector.load %arg5[%c0_6, %c0_7] : memref<128x128xf32, #tpu.memory_space<vmem>>, vector<128x128xf32>
    %cst_8 = arith.constant dense<0.000000e+00> : vector<8x128xf32>
    %9 = tpu.matmul %7, %8, %cst_8 {dimension_numbers = #tpu.dot_dimension_numbers<[1], [0], [0], [1], [0, 0, 1, 1], [], []>} : vector<8x128xf32>, vector<128x128xf32>, vector<8x128xf32> -> vector<8x128xf32>
    %c0_9 = arith.constant 0 : index
    %c0_10 = arith.constant 0 : index
    %10 = vector.load %arg6[%c0_9, %c0_10] : memref<1x128xf32, #tpu.memory_space<vmem>>, vector<1x128xf32>
    %11 = vector.broadcast %10 : vector<1x128xf32> to vector<8x128xf32>
    %12 = arith.addf %9, %11 : vector<8x128xf32>
    %c0_11 = arith.constant 0 : index
    %c0_12 = arith.constant 0 : index
    %13 = vector.load %arg7[%c0_11, %c0_12] : memref<8x128xf32, #tpu.memory_space<vmem>>, vector<8x128xf32>
    tpu.vector_store %arg7[%c0_11, %c0_12], %12 {strides = array<i32>} : memref<8x128xf32, #tpu.memory_space<vmem>>, vector<8x128xf32>,
    return
  }
  func.func @transform_0(%arg0: i32, %arg1: i32) -> (i32, i32) {
    %c0_i32 = arith.constant 0 : i32
    %c0_i32_0 = arith.constant 0 : i32
    return %arg0, %c0_i32 : i32, i32
  }
  func.func @transform_1(%arg0: i32, %arg1: i32) -> (i32, i32) {
    %c0_i32 = arith.constant 0 : i32
    %c0_i32_0 = arith.constant 0 : i32
    %c0_i32_1 = arith.constant 0 : i32
    return %c0_i32, %c0_i32_0 : i32, i32
  }
  func.func @transform_2(%arg0: i32, %arg1: i32) -> (i32, i32) {
    %c0_i32 = arith.constant 0 : i32
    %c0_i32_0 = arith.constant 0 : i32
    %c0_i32_1 = arith.constant 0 : i32
    return %c0_i32, %c0_i32_0 : i32, i32
  }
  func.func @transform_3(%arg0: i32, %arg1: i32) -> (i32, i32) {
    %c0_i32 = arith.constant 0 : i32
    %c0_i32_0 = arith.constant 0 : i32
    return %c0_i32, %arg1 : i32, i32
  }
  func.func @transform_4(%arg0: i32, %arg1: i32) -> (i32, i32) {
    %c0_i32 = arith.constant 0 : i32
    %c0_i32_0 = arith.constant 0 : i32
    return %c0_i32, %arg1 : i32, i32
  }
  func.func @transform_5(%arg0: i32, %arg1: i32) -> (i32, i32) {
    %c0_i32 = arith.constant 0 : i32
    return %arg0, %arg1 : i32, i32
  }
}

</mosaic_0001>

<bundles_post_ra>
// kernel: tpu_custom_call.1
= control target key start
LH: loop header
LB: loop body
LE: loop exit
PB: predicated region body
PF: predicated region fallthrough
CT: control target
= control target key end

     0   :  { %10 = vsyncpa [#allocation3], 0  ;;  %s796_s0 = inlined_call_operand.vmem [shape: f32[16,8], index: 0, kind: input, shape index: {}]   ;;  %s797_s1 = inlined_call_operand.vmem [shape: f32[8,128], index: 1, kind: input, shape index: {}]   ;;  %s798_s2 = inlined_call_operand.vmem [shape: f32[1,128], index: 2, kind: input, shape index: {}]   ;;  %s799_s3 = inlined_call_operand.hbm [shape: f32[128,128], index: 3, kind: input, shape index: {}]   ;;  %s800_s4 = inlined_call_operand.vmem [shape: f32[1,128], index: 4, kind: input, shape index: {}]   ;;  %s801_s5 = inlined_call_operand.hbm [shape: f32[16,128], index: 5, kind: output, shape index: {}]  }
   0x1   :  { %11 = vsyncpa [#allocation4], 0 }
   0x2   :  { %13 = vsyncpa [#allocation4 + $0x1], 0  ;;  %s687_s18 = smov 0   ;;  %s689_s19 = smov 0  }
   0x3   :  { %s691_s20 = smov 0   ;;  %s693_s21 = smov 0  }
   0x4   :  { %s695_s22 = smov 0   ;;  %s697_s23 = smov 0  }
   0x5 LB: > { %s455_s24 = sadd.s32 4294967295, %s652_s23   ;;  %s456_s25 = sadd.s32 4294967294, %s652_s23   ;;  %s652_s23 = sphi %s697_s23, %s19_s23   ;;  %s648_s22 = sphi %s695_s22, %s808_s22   ;;  %s644_s21 = sphi %s693_s21, %s807_s21   ;;  %s640_s20 = sphi %s691_s20, %s806_s20   ;;  %s636_s19 = sphi %s689_s19, %s805_s19   ;;  %s632_s18 = sphi %s687_s18, %s804_s18  }
   0x6   : > { %s31_s26 = sadd.s32 1, %s648_s22  ;;  %s160_s27 = sadd.s32 1, %s640_s20 }
   0x7   : > { %p33_p0 = scmp.ge.s32.totalorder %s31_s26, 2  ;;  %p170_p1 = scmp.ne.s32.totalorder %s640_s20, %s636_s19 }
   0x8   : > { %p171_p2 = scmp.eq.s32.totalorder %s455_s24, 1  ;;  %p176_p3 = scmp.ne.s32.totalorder %s636_s19, %s632_s18 }
   0x9   : > { %s810_s26 = smov (%p33_p0, %s31_s26), 0  ;;  %p177_p5 = scmp.eq.s32.totalorder %s456_s25, 1 }
   0xa   : > { %p727_p4 = por %p171_p2, %p170_p1  ;;  %s155_s29 = ssub.s32 %s648_s22, %s810_s26 }
   0xb   : > { %p457_p6 = scmp.ge.s32.totalorder %s652_s23, 1  ;;  %p158_p7 = scmp.eq.s32.totalorder %s155_s29, 0 }
   0xc   : > { %p734_p8 = por %p177_p5, %p176_p3  ;;  %p184_p9 = scmp.lt.s32.totalorder %s652_s23, 3 }
   0xd   : > { %s740_s6 = scalar_select %p158_p7, %s640_s20, %s160_s27  }
   0xe   : > { %p185_p10 = pnand %p457_p6, %p184_p9  ;;  %p484_p11 = scmp.eq.s32.totalorder %s455_s24, 0 }
   0xf   : > { %s203_s9 = sshll.u32 %s799_s3, 4  ;;  %s654_s10 = smov [#allocation2]   ;;  %s204_s9 = int_to_ptr.hbm [resolvable:$true] %s203_s9 }
  0x10   : > { %p476_p12 = pneg %p185_p10  ;;  %s205_s11 = sshll.u32 %s654_s10, 4  ;;  %s206_s11 = int_to_ptr.vmem [resolvable:$true] %s205_s11 }
  0x11   : > { %s655_s12 = smov 128   ;;  %s656_s13 = smov 8  }
  0x12   : > { %p477_p13 = pnand %p484_p11, %p476_p12  ;;  %234 = sbr.rel (%p185_p10) target bundleno = 292 (0x124), region = 40 }
  0x14   : > { %479 = dma.hbm_to_vmem [thread:$0]  (!%p477_p13), %s204_s9, 2048, %s206_s11, [#allocation3], %s655_s12, %s655_s12, %s656_s13  }
  0x17   : > { %623 = dma.done.wait (%p484_p11), [#allocation3], 2048  }
  0x18   : > { %625 = vsyncadd (%p484_p11), [#allocation3], 4294965248  ;;  %p265_p0 = scmp.lt.s32.totalorder %s644_s21, 1  ;;  %vm278_vm0 = vcmask 64512   ;;  %v273_v0 = vld [vmem:[%s797_s1] sm:$0xff]  ;;  %v318_v2 = vld [vmem:[#allocation2 + $0x78] sm:$0xff] }
  0x19   : > { %297 = vmatpush.msra.mxu0 %v273_v0  ;;  %323 = vmatpush.msra.mxu1 %v318_v2  ;;  %v317_v3 = vld [vmem:[#allocation2 + $0x70] sm:$0xff]  ;;  %v316_v4 = vld [vmem:[#allocation2 + $0x68] sm:$0xff]  ;;  %v315_v5 = vld [vmem:[#allocation2 + $0x60] sm:$0xff]  ;;  %s262_s8 = sand.u32 1, %s636_s19   ;;  %s467_s10 = sshll.u32 %s644_s21, 3 }
  0x1a   : > { %s266_s14 = scalar_select %p265_p0, %s644_s21, 1  ;;  %v314_v6 = vld [vmem:[#allocation2 + $0x58] sm:$0xff]  ;;  %v313_v7 = vld [vmem:[#allocation2 + $0x50] sm:$0xff]  ;;  %v312_v8 = vld [vmem:[#allocation2 + $0x48] sm:$0xff] }
  0x1b   : > { %324 = vmatpush.msra.mxu1 %v317_v3  ;;  %v311_v9 = vld [vmem:[#allocation2 + $0x40] sm:$0xff]  ;;  %v310_v10 = vld [vmem:[#allocation2 + $0x38] sm:$0xff]  ;;  %v309_v11 = vld [vmem:[#allocation2 + $0x30] sm:$0xff]  ;;  %s463_s9 = sshll.u32 %s262_s8, 3  ;;  %s356_s13 = scalar_lea.hbm %s801_s5, %s467_s10 }
  0x1c   : > { %s464_s15 = sshll.u32 %s266_s14, 3  ;;  %v308_v12 = vld [vmem:[#allocation2 + $0x28] sm:$0xff]  ;;  %v307_v13 = vld [vmem:[#allocation2 + $0x20] sm:$0xff]  ;;  %v306_v14 = vld [vmem:[#allocation2 + $0x18] sm:$0xff]  ;;  %s264_s16 = scalar_lea.vmem [#allocation5], %s463_s9 }
  0x1d   : > { %s268_s24 = scalar_lea.vmem %s796_s0, %s464_s15  ;;  %325 = vmatpush.msra.mxu1 %v316_v4  ;;  %v305_v15 = vld [vmem:[#allocation2 + $0x10] sm:$0xff]  ;;  %v304_v16 = vld [vmem:[#allocation2 + $0x8] sm:$0xff]  ;;  %v303_v17 = vld [vmem:[#allocation2] sm:$0xff]  ;;  %s358_s17 = sshll.u32 %s264_s16, 4  ;;  %s359_s17 = int_to_ptr.vmem [resolvable:$true] %s358_s17 }
  0x1e   : > { %v272_v1 = vld [vmem:[%s268_s24] sm:$0xff]  ;;  %s360_s24 = sshll.u32 %s356_s13, 4  ;;  %s345_s25 = scalar_lea.sflag [#allocation4], %s262_s8  ;;  %s361_s24 = int_to_ptr.hbm [resolvable:$true] %s360_s24 }
  0x1f   : > { %465 = vmatmul.msk.f32.vlgmr.msra.gmra.mxu0 %vm278_vm0, %v272_v1  ;;  %326 = vmatpush.msra.mxu1 %v315_v5  ;;  %v538_v18 = vld [vmem:[%s798_s2] ss:$0 sm:$0xff]  ;;  %s584_s27 = sshra.s32 %s361_s24, 4  ;;  %s590_s10 = scalar_lea.hbm %s801_s5, 16  ;;  %s585_s27 = int_to_ptr.hbm [resolvable:$true] %s584_s27 }
  0x20   : > { %v539_v22 = vld [vmem:[%s800_s4] ss:$0 sm:$0xff]  ;;  %s586_s21 = scalar_lea.hbm %s585_s27, 8  ;;  %p591_p5 = scmp.lt.s32.totalorder %s585_s27, %s801_s5 }
  0x21   : > { %327 = vmatpush.msra.mxu1 %v314_v6  ;;  %p587_p1 = scmp.ne.s32.totalorder %s585_s27, %s586_s21  ;;  %p592_p6 = scmp.lt.s32.totalorder %s590_s10, %s586_s21 }
  0x23   : > { %328 = vmatpush.msra.mxu1 %v313_v7  ;;  %p588_p2 = pnand %p587_p1, %p727_p4  ;;  %p593_p7 = por %p592_p6, %p591_p5 }
  0x25   : > { %329 = vmatpush.msra.mxu1 %v312_v8  ;;  %p589_p3 = pneg %p588_p2 }
  0x27   : > { %330 = vmatpush.msra.mxu1 %v311_v9  ;;  %p594_p9 = pnand %p593_p7, %p589_p3 }
  0x29   : > { %331 = vmatpush.msra.mxu1 %v310_v10 }
  0x2b   : > { %332 = vmatpush.msra.mxu1 %v309_v11 }
  0x2d   : > { %333 = vmatpush.msra.mxu1 %v308_v12 }
  0x2f   : > { %334 = vmatpush.msra.mxu1 %v307_v13 }
  0x31   : > { %335 = vmatpush.msra.mxu1 %v306_v14 }
  0x33   : > { %336 = vmatpush.msra.mxu1 %v305_v15 }
  0x35   : > { %337 = vmatpush.msra.mxu1 %v304_v16 }
  0x37   : > { %338 = vmatpush.msra.mxu1 %v303_v17 }
  0x9c   : > { %v299_v19 = vpop.f32.mrf.mxu0 }
  0x9d   : > { %v300_v20 = vadd.f32 %v538_v18, %v299_v19 }
  0x9f   : > { %v302_v21 = vmax.f32 %v300_v20, 0.0 }
  0xa1   : > { %339 = vmatmul.f32.vlgmr.msra.gmra.mxu1 %v302_v21 }
 0x11e   : > { %v340_v23 = vpop.f32.mrf.mxu1 }
 0x11f   : > { %v341_v24 = vadd.f32 %v539_v22, %v340_v23 }
 0x121   : > { %343 = vst [vmem:[%s264_s16] sm:$0xff] %v341_v24 }
 0x122   : > { %597 = shalt.err (!%p594_p9)
}
 0x123   : > { %474 = dma.vmem_to_hbm [thread:$0]  (%p727_p4), %s359_s17, 128, %s361_s24, %s345_s25  }
 0x124 PF: > { %p486_p10 = scmp.ge.s32.totalorder %s652_s23, 2  ;;  %s372_s8 = sand.u32 1, %s632_s18  }
 0x125   : > { %s373_s12 = scalar_lea.sflag [#allocation4], %s372_s8 }
 0x126   : > { %p481_p11 = pnand %p486_p10, %p734_p8 }
 0x128   : > { %p482_p12 = pneg %p481_p11 }
 0x12a   : > { %627 = dma.done.wait (%p482_p12), %s373_s12, 128  }
 0x12b   : > { %629 = vsyncadd (%p482_p12), %s373_s12, 4294967168  ;;  %s19_s23 = sadd.s32 1, %s652_s23   ;;  %s804_s18 = smov %s636_s19 }
 0x12c   : > { %p16_p13 = scmp.ge.s32.totalorder %s19_s23, 4   ;;  %s805_s19 = smov %s640_s20 }
 0x12d   : > { %s806_s20 = smov %s740_s6  ;;  %s807_s21 = smov %s648_s22 }
 0x12e   : > { %s808_s22 = smov %s810_s26  ;;  %18 = sbr.rel (!%p16_p13) target bundleno = 5 (0x5), region = 84 }
 0x133   :  { %379 = vsyncpa [#allocation3], 1 }
 0x134   :  { %381 = vsyncpa [#allocation3 + $0x1], 1 }
 0x135   :  { %382 = vsyncpa [#allocation4], 1 }
 0x136   :  { %384 = vsyncpa [#allocation4 + $0x1], 1 }

// kernel: tpu_custom_call.1
= control target key start
LH: loop header
LB: loop body
LE: loop exit
PB: predicated region body
PF: predicated region fallthrough
CT: control target
= control target key end

     0   :  { %10 = vsyncpa [#allocation3], 0  ;;  %s796_s0 = inlined_call_operand.vmem [shape: f32[16,8], index: 0, kind: input, shape index: {}]   ;;  %s797_s1 = inlined_call_operand.vmem [shape: f32[8,128], index: 1, kind: input, shape index: {}]   ;;  %s798_s2 = inlined_call_operand.vmem [shape: f32[1,128], index: 2, kind: input, shape index: {}]   ;;  %s799_s3 = inlined_call_operand.hbm [shape: f32[128,128], index: 3, kind: input, shape index: {}]   ;;  %s800_s4 = inlined_call_operand.vmem [shape: f32[1,128], index: 4, kind: input, shape index: {}]   ;;  %s801_s5 = inlined_call_operand.hbm [shape: f32[16,128], index: 5, kind: output, shape index: {}]  }
   0x1   :  { %11 = vsyncpa [#allocation4], 0 }
   0x2   :  { %13 = vsyncpa [#allocation4 + $0x1], 0  ;;  %s687_s18 = smov 0   ;;  %s689_s19 = smov 0  }
   0x3   :  { %s691_s20 = smov 0   ;;  %s693_s21 = smov 0  }
   0x4   :  { %s695_s22 = smov 0   ;;  %s697_s23 = smov 0  }
   0x5 LB: > { %s455_s24 = sadd.s32 4294967295, %s652_s23   ;;  %s456_s25 = sadd.s32 4294967294, %s652_s23   ;;  %s652_s23 = sphi %s697_s23, %s19_s23   ;;  %s648_s22 = sphi %s695_s22, %s808_s22   ;;  %s644_s21 = sphi %s693_s21, %s807_s21   ;;  %s640_s20 = sphi %s691_s20, %s806_s20   ;;  %s636_s19 = sphi %s689_s19, %s805_s19   ;;  %s632_s18 = sphi %s687_s18, %s804_s18  }
   0x6   : > { %s31_s26 = sadd.s32 1, %s648_s22  ;;  %s160_s27 = sadd.s32 1, %s640_s20 }
   0x7   : > { %p33_p0 = scmp.ge.s32.totalorder %s31_s26, 2  ;;  %p170_p1 = scmp.ne.s32.totalorder %s640_s20, %s636_s19 }
   0x8   : > { %p171_p2 = scmp.eq.s32.totalorder %s455_s24, 1  ;;  %p176_p3 = scmp.ne.s32.totalorder %s636_s19, %s632_s18 }
   0x9   : > { %s810_s26 = smov (%p33_p0, %s31_s26), 0  ;;  %p177_p5 = scmp.eq.s32.totalorder %s456_s25, 1 }
   0xa   : > { %p727_p4 = por %p171_p2, %p170_p1  ;;  %s155_s29 = ssub.s32 %s648_s22, %s810_s26 }
   0xb   : > { %p457_p6 = scmp.ge.s32.totalorder %s652_s23, 1  ;;  %p158_p7 = scmp.eq.s32.totalorder %s155_s29, 0 }
   0xc   : > { %p734_p8 = por %p177_p5, %p176_p3  ;;  %p184_p9 = scmp.lt.s32.totalorder %s652_s23, 3 }
   0xd   : > { %s740_s6 = scalar_select %p158_p7, %s640_s20, %s160_s27  }
   0xe   : > { %p185_p10 = pnand %p457_p6, %p184_p9  ;;  %p484_p11 = scmp.eq.s32.totalorder %s455_s24, 0 }
   0xf   : > { %s203_s9 = sshll.u32 %s799_s3, 4  ;;  %s654_s10 = smov [#allocation2]   ;;  %s204_s9 = int_to_ptr.hbm [resolvable:$true] %s203_s9 }
  0x10   : > { %p476_p12 = pneg %p185_p10  ;;  %s205_s11 = sshll.u32 %s654_s10, 4  ;;  %s206_s11 = int_to_ptr.vmem [resolvable:$true] %s205_s11 }
  0x11   : > { %s655_s12 = smov 128   ;;  %s656_s13 = smov 8  }
  0x12   : > { %p477_p13 = pnand %p484_p11, %p476_p12  ;;  %234 = sbr.rel (%p185_p10) target bundleno = 292 (0x124), region = 40 }
  0x14   : > { %479 = dma.hbm_to_vmem [thread:$0]  (!%p477_p13), %s204_s9, 2048, %s206_s11, [#allocation3], %s655_s12, %s655_s12, %s656_s13  }
  0x17   : > { %623 = dma.done.wait (%p484_p11), [#allocation3], 2048  }
  0x18   : > { %625 = vsyncadd (%p484_p11), [#allocation3], 4294965248  ;;  %p265_p0 = scmp.lt.s32.totalorder %s644_s21, 1  ;;  %vm278_vm0 = vcmask 64512   ;;  %v273_v0 = vld [vmem:[%s797_s1] sm:$0xff]  ;;  %v318_v2 = vld [vmem:[#allocation2 + $0x78] sm:$0xff] }
  0x19   : > { %297 = vmatpush.msra.mxu0 %v273_v0  ;;  %323 = vmatpush.msra.mxu1 %v318_v2  ;;  %v317_v3 = vld [vmem:[#allocation2 + $0x70] sm:$0xff]  ;;  %v316_v4 = vld [vmem:[#allocation2 + $0x68] sm:$0xff]  ;;  %v315_v5 = vld [vmem:[#allocation2 + $0x60] sm:$0xff]  ;;  %s262_s8 = sand.u32 1, %s636_s19   ;;  %s467_s10 = sshll.u32 %s644_s21, 3 }
  0x1a   : > { %s266_s14 = scalar_select %p265_p0, %s644_s21, 1  ;;  %v314_v6 = vld [vmem:[#allocation2 + $0x58] sm:$0xff]  ;;  %v313_v7 = vld [vmem:[#allocation2 + $0x50] sm:$0xff]  ;;  %v312_v8 = vld [vmem:[#allocation2 + $0x48] sm:$0xff] }
  0x1b   : > { %324 = vmatpush.msra.mxu1 %v317_v3  ;;  %v311_v9 = vld [vmem:[#allocation2 + $0x40] sm:$0xff]  ;;  %v310_v10 = vld [vmem:[#allocation2 + $0x38] sm:$0xff]  ;;  %v309_v11 = vld [vmem:[#allocation2 + $0x30] sm:$0xff]  ;;  %s463_s9 = sshll.u32 %s262_s8, 3  ;;  %s356_s13 = scalar_lea.hbm %s801_s5, %s467_s10 }
  0x1c   : > { %s464_s15 = sshll.u32 %s266_s14, 3  ;;  %v308_v12 = vld [vmem:[#allocation2 + $0x28] sm:$0xff]  ;;  %v307_v13 = vld [vmem:[#allocation2 + $0x20] sm:$0xff]  ;;  %v306_v14 = vld [vmem:[#allocation2 + $0x18] sm:$0xff]  ;;  %s264_s16 = scalar_lea.vmem [#allocation5], %s463_s9 }
  0x1d   : > { %s268_s24 = scalar_lea.vmem %s796_s0, %s464_s15  ;;  %325 = vmatpush.msra.mxu1 %v316_v4  ;;  %v305_v15 = vld [vmem:[#allocation2 + $0x10] sm:$0xff]  ;;  %v304_v16 = vld [vmem:[#allocation2 + $0x8] sm:$0xff]  ;;  %v303_v17 = vld [vmem:[#allocation2] sm:$0xff]  ;;  %s358_s17 = sshll.u32 %s264_s16, 4  ;;  %s359_s17 = int_to_ptr.vmem [resolvable:$true] %s358_s17 }
  0x1e   : > { %v272_v1 = vld [vmem:[%s268_s24] sm:$0xff]  ;;  %s360_s24 = sshll.u32 %s356_s13, 4  ;;  %s345_s25 = scalar_lea.sflag [#allocation4], %s262_s8  ;;  %s361_s24 = int_to_ptr.hbm [resolvable:$true] %s360_s24 }
  0x1f   : > { %465 = vmatmul.msk.f32.vlgmr.msra.gmra.mxu0 %vm278_vm0, %v272_v1  ;;  %326 = vmatpush.msra.mxu1 %v315_v5  ;;  %v538_v18 = vld [vmem:[%s798_s2] ss:$0 sm:$0xff]  ;;  %s584_s27 = sshra.s32 %s361_s24, 4  ;;  %s590_s10 = scalar_lea.hbm %s801_s5, 16  ;;  %s585_s27 = int_to_ptr.hbm [resolvable:$true] %s584_s27 }
  0x20   : > { %v539_v22 = vld [vmem:[%s800_s4] ss:$0 sm:$0xff]  ;;  %s586_s21 = scalar_lea.hbm %s585_s27, 8  ;;  %p591_p5 = scmp.lt.s32.totalorder %s585_s27, %s801_s5 }
  0x21   : > { %327 = vmatpush.msra.mxu1 %v314_v6  ;;  %p587_p1 = scmp.ne.s32.totalorder %s585_s27, %s586_s21  ;;  %p592_p6 = scmp.lt.s32.totalorder %s590_s10, %s586_s21 }
  0x23   : > { %328 = vmatpush.msra.mxu1 %v313_v7  ;;  %p588_p2 = pnand %p587_p1, %p727_p4  ;;  %p593_p7 = por %p592_p6, %p591_p5 }
  0x25   : > { %329 = vmatpush.msra.mxu1 %v312_v8  ;;  %p589_p3 = pneg %p588_p2 }
  0x27   : > { %330 = vmatpush.msra.mxu1 %v311_v9  ;;  %p594_p9 = pnand %p593_p7, %p589_p3 }
  0x29   : > { %331 = vmatpush.msra.mxu1 %v310_v10 }
  0x2b   : > { %332 = vmatpush.msra.mxu1 %v309_v11 }
  0x2d   : > { %333 = vmatpush.msra.mxu1 %v308_v12 }
  0x2f   : > { %334 = vmatpush.msra.mxu1 %v307_v13 }
  0x31   : > { %335 = vmatpush.msra.mxu1 %v306_v14 }
  0x33   : > { %336 = vmatpush.msra.mxu1 %v305_v15 }
  0x35   : > { %337 = vmatpush.msra.mxu1 %v304_v16 }
  0x37   : > { %338 = vmatpush.msra.mxu1 %v303_v17 }
  0x9c   : > { %v299_v19 = vpop.f32.mrf.mxu0 }
  0x9d   : > { %v300_v20 = vadd.f32 %v538_v18, %v299_v19 }
  0x9f   : > { %v302_v21 = vmax.f32 %v300_v20, 0.0 }
  0xa1   : > { %339 = vmatmul.f32.vlgmr.msra.gmra.mxu1 %v302_v21 }
 0x11e   : > { %v340_v23 = vpop.f32.mrf.mxu1 }
 0x11f   : > { %v341_v24 = vadd.f32 %v539_v22, %v340_v23 }
 0x121   : > { %343 = vst [vmem:[%s264_s16] sm:$0xff] %v341_v24 }
 0x122   : > { %597 = shalt.err (!%p594_p9)
}
 0x123   : > { %474 = dma.vmem_to_hbm [thread:$0]  (%p727_p4), %s359_s17, 128, %s361_s24, %s345_s25  }
 0x124 PF: > { %p486_p10 = scmp.ge.s32.totalorder %s652_s23, 2  ;;  %s372_s8 = sand.u32 1, %s632_s18  }
 0x125   : > { %s373_s12 = scalar_lea.sflag [#allocation4], %s372_s8 }
 0x126   : > { %p481_p11 = pnand %p486_p10, %p734_p8 }
 0x128   : > { %p482_p12 = pneg %p481_p11 }
 0x12a   : > { %627 = dma.done.wait (%p482_p12), %s373_s12, 128  }
 0x12b   : > { %629 = vsyncadd (%p482_p12), %s373_s12, 4294967168  ;;  %s19_s23 = sadd.s32 1, %s652_s23   ;;  %s804_s18 = smov %s636_s19 }
 0x12c   : > { %p16_p13 = scmp.ge.s32.totalorder %s19_s23, 4   ;;  %s805_s19 = smov %s640_s20 }
 0x12d   : > { %s806_s20 = smov %s740_s6  ;;  %s807_s21 = smov %s648_s22 }
 0x12e   : > { %s808_s22 = smov %s810_s26  ;;  %18 = sbr.rel (!%p16_p13) target bundleno = 5 (0x5), region = 84 }
 0x133   :  { %379 = vsyncpa [#allocation3], 1 }
 0x134   :  { %381 = vsyncpa [#allocation3 + $0x1], 1 }
 0x135   :  { %382 = vsyncpa [#allocation4], 1 }
 0x136   :  { %384 = vsyncpa [#allocation4 + $0x1], 1 }

</bundles_post_ra>
